<compile_context>
chip_gen: v7x
topology: tpu7x:2x2x1
jax: 0.10.0
libtpu: 0.0.40
codegen_flags: <defaults>
</compile_context>

<pallas_src>
import math

import numpy as np
import jax
import jax.numpy as jnp
from jax.experimental import pallas as pl
from jax.experimental.pallas import tpu as pltpu


# ----------------------------------------------------------------------------
# helpers
# ----------------------------------------------------------------------------
def _pick_tile(M, cap=256):
    """Largest tile <= cap that divides M (M is tiny here; trivially M itself)."""
    if M <= cap:
        return M
    for tm in range(cap, 0, -1):
        if M % tm == 0:
            return tm
    return M


# ----------------------------------------------------------------------------
# Kernel 1: masking + input projection   (mask_patches = masked_fill; h = x @ W + b)
# ----------------------------------------------------------------------------
def _masked_proj_kernel(p_ref, m_ref, w_ref, b_ref, o_ref):
    x = jnp.where(m_ref[...] > 0.0, 0.0, p_ref[...])
    y = jnp.dot(x, w_ref[...], preferred_element_type=jnp.float32) + b_ref[...]
    o_ref[...] = y.astype(o_ref.dtype)


def masked_proj(patches2d, mask2d, w, b):
    M, K = patches2d.shape
    N = w.shape[1]
    TM = _pick_tile(M)
    return pl.pallas_call(
        _masked_proj_kernel,
        out_shape=jax.ShapeDtypeStruct((M, N), jnp.float32),
        grid=(M // TM,),
        in_specs=[
            pl.BlockSpec((TM, K), lambda i: (i, 0)),
            pl.BlockSpec((TM, K), lambda i: (i, 0)),
            pl.BlockSpec((K, N), lambda i: (0, 0)),
            pl.BlockSpec((1, N), lambda i: (0, 0)),
        ],
        out_specs=pl.BlockSpec((TM, N), lambda i: (i, 0)),
        compiler_params=pltpu.CompilerParams(dimension_semantics=("parallel",)),
    )(patches2d, mask2d, w, b.reshape(1, N))


# ----------------------------------------------------------------------------
# Kernel 2: fused RoPE transformer encoder layer (post-norm), one call per layer
#   grid over N = batch*channels; block (1, P, E) is lane-dense (E on lanes).
# ----------------------------------------------------------------------------
def _make_layer_kernel(nhead, scale):
    def kernel(h_ref, wqkv_ref, bqkv_ref, wo_ref, bo_ref,
               g1_ref, b1_ref, w1_ref, fb1_ref, w2_ref, fb2_ref,
               g2_ref, b2_ref, cos_ref, sin_ref, rot_ref, o_ref):
        x = h_ref[0]                                   # (P, E)
        P, E = x.shape
        Dh = E // nhead

        # ---- fused QKV projection (single MXU matmul, 3E output lanes) ----
        qkv = jnp.dot(x, wqkv_ref[...], preferred_element_type=jnp.float32) + bqkv_ref[...]
        q = qkv[:, 0:E]
        k = qkv[:, E:2 * E]
        v = qkv[:, 2 * E:3 * E]

        # ---- RoPE: rotate_half folded into signed permutation matrix R ----
        cos = cos_ref[...]
        sin = sin_ref[...]
        rot = rot_ref[...]

        def rope(t):
            return t * cos + jnp.dot(t, rot, preferred_element_type=jnp.float32) * sin

        q = rope(q)
        k = rope(k)

        # ---- per-head attention; heads are contiguous Dh-wide lane slices ----
        outs = []
        for hh in range(nhead):
            sl = slice(hh * Dh, (hh + 1) * Dh)
            qs, ks, vs = q[:, sl], k[:, sl], v[:, sl]
            s = jax.lax.dot_general(qs, ks, (((1,), (1,)), ((), ())),
                                    preferred_element_type=jnp.float32) * scale
            s = s - jnp.max(s, axis=-1, keepdims=True)
            p = jnp.exp(s)
            p = p * pl.reciprocal(jnp.sum(p, axis=-1, keepdims=True), approx=True)
            outs.append(jnp.dot(p, vs, preferred_element_type=jnp.float32))
        attn = jnp.concatenate(outs, axis=-1)          # (P, E)

        # ---- out projection ----
        attn = jnp.dot(attn, wo_ref[...], preferred_element_type=jnp.float32) + bo_ref[...]

        def layer_norm(t, g, b):
            mu = jnp.mean(t, axis=-1, keepdims=True)
            var = jnp.mean((t - mu) ** 2, axis=-1, keepdims=True)
            return (t - mu) * jax.lax.rsqrt(var + 1e-5) * g + b

        # ---- residual + norm1 ----
        h1 = layer_norm(x + attn, g1_ref[...], b1_ref[...])

        # ---- FFN (linear -> ReLU -> linear) ----
        ffn = jnp.dot(h1, w1_ref[...], preferred_element_type=jnp.float32) + fb1_ref[...]
        ffn = jnp.maximum(ffn, 0.0)
        ffn = jnp.dot(ffn, w2_ref[...], preferred_element_type=jnp.float32) + fb2_ref[...]

        # ---- residual + norm2 ----
        h2 = layer_norm(h1 + ffn, g2_ref[...], b2_ref[...])
        o_ref[0] = h2.astype(o_ref.dtype)

    return kernel


def encoder_layer(h, p, nhead, COS, SIN, R):
    N, P, E = h.shape
    Dh = E // nhead
    FF = p["w1"].shape[1]
    scale = 1.0 / math.sqrt(Dh)

    def full(shape):
        return pl.BlockSpec(shape, lambda n, _s=len(shape): (0,) * _s)

    return pl.pallas_call(
        _make_layer_kernel(nhead, scale),
        out_shape=jax.ShapeDtypeStruct((N, P, E), jnp.float32),
        grid=(N,),
        in_specs=[
            pl.BlockSpec((1, P, E), lambda n: (n, 0, 0)),    # h
            full((E, 3 * E)), full((1, 3 * E)),              # wqkv, bqkv
            full((E, E)), full((1, E)),                      # wo, bo
            full((1, E)), full((1, E)),                      # g1, b1
            full((E, FF)), full((1, FF)),                    # w1, fb1
            full((FF, E)), full((1, E)),                     # w2, fb2
            full((1, E)), full((1, E)),                      # g2, b2
            full((P, E)), full((P, E)),                      # COS, SIN
            full((E, E)),                                    # R (rotate_half matrix)
        ],
        out_specs=pl.BlockSpec((1, P, E), lambda n: (n, 0, 0)),
        compiler_params=pltpu.CompilerParams(dimension_semantics=("parallel",)),
    )(h, p["wqkv"], p["bqkv"].reshape(1, -1), p["wo"], p["bo"].reshape(1, -1),
      p["g1"].reshape(1, -1), p["b1"].reshape(1, -1),
      p["w1"], p["fb1"].reshape(1, -1), p["w2"], p["fb2"].reshape(1, -1),
      p["g2"].reshape(1, -1), p["b2"].reshape(1, -1),
      COS, SIN, R)


# ----------------------------------------------------------------------------
# Kernel 3: head projection fused with masked-MSE sum reduction
#   recons never hits HBM; scalar sum accumulated across the M-tile grid.
# ----------------------------------------------------------------------------
def _head_loss_kernel(h_ref, w_ref, b_ref, t_ref, m_ref, o_ref):
    @pl.when(pl.program_id(0) == 0)
    def _init():
        o_ref[...] = jnp.zeros_like(o_ref)

    recons = jnp.dot(h_ref[...], w_ref[...], preferred_element_type=jnp.float32) + b_ref[...]
    d = recons - t_ref[...]
    o_ref[...] = o_ref[...] + jnp.sum(d * d * m_ref[...], keepdims=True)


def head_masked_mse_sum(h2d, w, b, target2d, mask2d):
    M, E = h2d.shape
    Np = w.shape[1]
    TM = _pick_tile(M)
    return pl.pallas_call(
        _head_loss_kernel,
        out_shape=jax.ShapeDtypeStruct((1, 1), jnp.float32),
        grid=(M // TM,),
        in_specs=[
            pl.BlockSpec((TM, E), lambda i: (i, 0)),
            pl.BlockSpec((E, Np), lambda i: (0, 0)),
            pl.BlockSpec((1, Np), lambda i: (0, 0)),
            pl.BlockSpec((TM, Np), lambda i: (i, 0)),
            pl.BlockSpec((TM, Np), lambda i: (i, 0)),
        ],
        out_specs=pl.BlockSpec((1, 1), lambda i: (0, 0)),
        compiler_params=pltpu.CompilerParams(dimension_semantics=("arbitrary",)),
    )(h2d, w, b.reshape(1, Np), target2d, mask2d)


# ----------------------------------------------------------------------------
# Model glue (plain JAX): parameter init, RoPE tables, random mask, orchestration
# ----------------------------------------------------------------------------
def rope_tables(P, E, Dh):
    H = E // Dh
    half = Dh // 2
    inv_freq = 1.0 / (10000.0 ** (jnp.arange(0, half, dtype=jnp.float32) * 2.0 / Dh))
    t = jnp.arange(P, dtype=jnp.float32)
    ang = jnp.outer(t, inv_freq)                                   # (P, Dh/2)
    cos_h = jnp.concatenate([jnp.cos(ang), jnp.cos(ang)], axis=-1)  # (P, Dh)
    sin_h = jnp.concatenate([jnp.sin(ang), jnp.sin(ang)], axis=-1)  # (P, Dh)
    COS = jnp.tile(cos_h, (1, H))                                   # (P, E) per-head tiled
    SIN = jnp.tile(sin_h, (1, H))                                   # (P, E)
    # rotate_half(x) = x @ R   (per head: [x1, x2] -> [-x2, x1]); built exactly, no roll.
    R = np.zeros((E, E), np.float32)
    for h in range(H):
        base = h * Dh
        for j in range(half):
            R[base + j + half, base + j] = -1.0
            R[base + j, base + j + half] = 1.0
    return COS, SIN, jnp.asarray(R)


def init_params(patch_size, expansion_ratio, num_layers, nhead=6, seed=42):
    hidden = patch_size * expansion_ratio
    ff = hidden                                   # dim_feedforward = hidden_size
    key = jax.random.PRNGKey(seed)

    def nxt():
        nonlocal key
        key, sub = jax.random.split(key)
        return sub

    def w(shape, scale=0.05):
        return scale * jax.random.normal(nxt(), shape, jnp.float32)

    params = {
        "patch_size": patch_size,
        "hidden": hidden,
        "nhead": nhead,
        "proj_w": w((patch_size, hidden)),
        "proj_b": w((hidden,), 0.01),
        "head_w": w((hidden, patch_size)),
        "head_b": w((patch_size,), 0.01),
        "layers": [],
    }
    for _ in range(num_layers):
        params["layers"].append({
            "wqkv": w((hidden, 3 * hidden)), "bqkv": w((3 * hidden,), 0.01),
            "wo": w((hidden, hidden)), "bo": w((hidden,), 0.01),
            "g1": jnp.ones((hidden,), jnp.float32), "b1": jnp.zeros((hidden,), jnp.float32),
            "w1": w((hidden, ff)), "fb1": w((ff,), 0.01),
            "w2": w((ff, hidden)), "fb2": w((hidden,), 0.01),
            "g2": jnp.ones((hidden,), jnp.float32), "b2": jnp.zeros((hidden,), jnp.float32),
        })
    return params


def patch_detector_attention_forward(params, x, mask_key):
    """x: (batch, seq_len, num_channels), seq_len multiple of patch_size."""
    B, S, C = x.shape
    patch = params["patch_size"]
    E = params["hidden"]
    H = params["nhead"]
    NBC = B * C
    Pn = S // patch
    M = NBC * Pn

    xp = jnp.transpose(x, (0, 2, 1)).reshape(NBC, S)
    patches = xp.reshape(NBC, Pn, patch)                  # unfold(size=step=patch)

    # random binary mask: exactly Pn//2 kept (0) patches per row (argsort shuffle)
    noise = jax.random.uniform(mask_key, (NBC, Pn), dtype=jnp.float32)
    ids_shuffle = jnp.argsort(noise, axis=-1)
    ids_restore = jnp.argsort(ids_shuffle, axis=-1)
    len_keep = int(Pn * 0.5)
    mask = jnp.ones((NBC, Pn), jnp.float32).at[:, :len_keep].set(0.0)
    mask = jnp.take_along_axis(mask, ids_restore, axis=-1)
    mask3 = jnp.broadcast_to(mask[:, :, None], (NBC, Pn, patch))

    patches2d = patches.reshape(M, patch)
    mask2d = mask3.reshape(M, patch)

    # masking fused into the projection kernel
    h = masked_proj(patches2d, mask2d, params["proj_w"], params["proj_b"]).reshape(NBC, Pn, E)

    Dh = E // H
    COS, SIN, R = rope_tables(Pn, E, Dh)
    for lyr in params["layers"]:
        h = encoder_layer(h, lyr, H, COS, SIN, R)

    # head projection fused with masked-MSE reduction; mean over ALL elements
    # (matches torch: (recon_loss * mask).mean())
    ssum = head_masked_mse_sum(h.reshape(M, E), params["head_w"], params["head_b"],
                               patches2d, mask2d)
    return ssum[0, 0] / (M * patch)


# ----------------------------------------------------------------------------
if __name__ == "__main__":
    patch_size = 8
    expansion_ratio = 6        # hidden = 48, divisible by nhead=6 -> head_dim=8
    num_layers = 2

    B, S, C = 2, 64, 4         # seq_len multiple of patch_size -> 8 patches/row

    params = init_params(patch_size, expansion_ratio, num_layers)

    key = jax.random.PRNGKey(0)
    x_key, mask_key = jax.random.split(key)
    x = jax.random.normal(x_key, (B, S, C), dtype=jnp.float32)

    loss = patch_detector_attention_forward(params, x, mask_key)
    loss = jax.block_until_ready(loss)
    assert loss.shape == () and bool(jnp.isfinite(loss))
    print("KERNEL_OK")
</pallas_src>

<mosaic_0001>
module attributes {stable_mosaic.version = 11 : i64} {
  func.func @_masked_proj_kernel(%arg0: i32, %arg1: memref<64x8xf32, #tpu.memory_space<vmem>>, %arg2: memref<64x8xf32, #tpu.memory_space<vmem>>, %arg3: memref<8x48xf32, #tpu.memory_space<vmem>>, %arg4: memref<1x48xf32, #tpu.memory_space<vmem>>, %arg5: memref<64x48xf32, #tpu.memory_space<vmem>>) attributes {dimension_semantics = [#tpu.dimension_semantics<parallel>], iteration_bounds = array<i64: 1>, scalar_prefetch = 0 : i64, scratch_operands = 0 : i64, tpu.core_type = #tpu.core_type<tc>, window_params = [{transform_indices = @transform_0, window_bounds = array<i64: 64, 8>}, {transform_indices = @transform_1, window_bounds = array<i64: 64, 8>}, {pipeline_mode = #tpu.pipeline_mode<synchronous>, transform_indices = @transform_2, window_bounds = array<i64: 8, 48>}, {pipeline_mode = #tpu.pipeline_mode<synchronous>, transform_indices = @transform_3, window_bounds = array<i64: 1, 48>}, {transform_indices = @transform_4, window_bounds = array<i64: 64, 48>}]} {
    %c0 = arith.constant 0 : index
    %c0_0 = arith.constant 0 : index
    %0 = vector.load %arg2[%c0, %c0_0] : memref<64x8xf32, #tpu.memory_space<vmem>>, vector<64x8xf32>
    %cst = arith.constant 0.000000e+00 : f32
    %1 = vector.broadcast %cst : f32 to vector<64x8xf32>
    %2 = arith.cmpf ogt, %0, %1 : vector<64x8xf32>
    %c0_1 = arith.constant 0 : index
    %c0_2 = arith.constant 0 : index
    %3 = vector.load %arg1[%c0_1, %c0_2] : memref<64x8xf32, #tpu.memory_space<vmem>>, vector<64x8xf32>
    %cst_3 = arith.constant 0.000000e+00 : f32
    %4 = vector.broadcast %cst_3 : f32 to vector<64x8xf32>
    %5 = arith.select %2, %4, %3 : vector<64x8xi1>, vector<64x8xf32>
    %c0_4 = arith.constant 0 : index
    %c0_5 = arith.constant 0 : index
    %6 = vector.load %arg3[%c0_4, %c0_5] : memref<8x48xf32, #tpu.memory_space<vmem>>, vector<8x48xf32>
    %cst_6 = arith.constant dense<0.000000e+00> : vector<64x48xf32>
    %7 = tpu.matmul %5, %6, %cst_6 {dimension_numbers = #tpu.dot_dimension_numbers<[1], [0], [0], [1], [0, 0, 1, 1], [], []>} : vector<64x8xf32>, vector<8x48xf32>, vector<64x48xf32> -> vector<64x48xf32>
    %c0_7 = arith.constant 0 : index
    %c0_8 = arith.constant 0 : index
    %8 = vector.load %arg4[%c0_7, %c0_8] : memref<1x48xf32, #tpu.memory_space<vmem>>, vector<1x48xf32>
    %9 = vector.broadcast %8 : vector<1x48xf32> to vector<64x48xf32>
    %10 = arith.addf %7, %9 : vector<64x48xf32>
    %c0_9 = arith.constant 0 : index
    %c0_10 = arith.constant 0 : index
    %11 = vector.load %arg5[%c0_9, %c0_10] : memref<64x48xf32, #tpu.memory_space<vmem>>, vector<64x48xf32>
    tpu.vector_store %arg5[%c0_9, %c0_10], %10 {strides = array<i32>} : memref<64x48xf32, #tpu.memory_space<vmem>>, vector<64x48xf32>,
    return
  }
  func.func @transform_0(%arg0: i32) -> (i32, i32) {
    %c0_i32 = arith.constant 0 : i32
    %c0_i32_0 = arith.constant 0 : i32
    return %arg0, %c0_i32 : i32, i32
  }
  func.func @transform_1(%arg0: i32) -> (i32, i32) {
    %c0_i32 = arith.constant 0 : i32
    %c0_i32_0 = arith.constant 0 : i32
    return %arg0, %c0_i32 : i32, i32
  }
  func.func @transform_2(%arg0: i32) -> (i32, i32) {
    %c0_i32 = arith.constant 0 : i32
    %c0_i32_0 = arith.constant 0 : i32
    %c0_i32_1 = arith.constant 0 : i32
    return %c0_i32, %c0_i32_0 : i32, i32
  }
  func.func @transform_3(%arg0: i32) -> (i32, i32) {
    %c0_i32 = arith.constant 0 : i32
    %c0_i32_0 = arith.constant 0 : i32
    %c0_i32_1 = arith.constant 0 : i32
    return %c0_i32, %c0_i32_0 : i32, i32
  }
  func.func @transform_4(%arg0: i32) -> (i32, i32) {
    %c0_i32 = arith.constant 0 : i32
    %c0_i32_0 = arith.constant 0 : i32
    return %arg0, %c0_i32 : i32, i32
  }
}

</mosaic_0001>

<bundles_post_ra>
// kernel: tpu_custom_call.1
= control target key start
LH: loop header
LB: loop body
LE: loop exit
PB: predicated region body
PF: predicated region fallthrough
CT: control target
= control target key end

     0   :  { %vm57_vm0 = vcmask 64512   ;;  %vm187_vm9 = vcmask 392192   ;;  %s353_s2 = inlined_call_operand.vmem [shape: f32[8,48], index: 2, kind: input, shape index: {}]   ;;  %s354_s0 = inlined_call_operand.vmem [shape: f32[64,8], index: 0, kind: input, shape index: {}]   ;;  %s355_s1 = inlined_call_operand.vmem [shape: f32[64,8], index: 1, kind: input, shape index: {}]   ;;  %s356_s3 = inlined_call_operand.vmem [shape: f32[1,48], index: 3, kind: input, shape index: {}]   ;;  %s357_s4 = inlined_call_operand.vmem [shape: f32[64,48], index: 4, kind: output, shape index: {}]  }
   0x1   :  { %v49_v0 = vld [vmem:[%s353_s2] sm:$0xff]  ;;  %v18_v5 = vld [vmem:[%s355_s1 + $0x8] sm:$0xff]  ;;  %v19_v12 = vld [vmem:[%s355_s1 + $0x10] sm:$0xff] }
   0x2   :  { %v17_v1 = vld [vmem:[%s355_s1] sm:$0xff]  ;;  %218 = vmatprep.subr.mxu0 %v49_v0  ;;  %232 = vmatprep.subr.mxu1 %v49_v0  ;;  %vm26_vm3 = vcmp.gt.f32.partialorder %v18_v5, 0.0  ;;  %v34_v7 = vld [vmem:[%s354_s0 + $0x8] sm:$0xff]  ;;  %v35_v13 = vld [vmem:[%s354_s0 + $0x10] sm:$0xff]  ;;  %vm27_vm5 = vcmp.gt.f32.partialorder %v19_v12, 0.0 }
   0x3   :  { %v33_v2 = vld [vmem:[%s354_s0] sm:$0xff]  ;;  %vm25_vm1 = vcmp.gt.f32.partialorder %v17_v1, 0.0  ;;  %219 = vmatpush3.msra.mxu0 %v49_v0  ;;  %233 = vmatpush3.msra.mxu1 %v49_v0  ;;  %v22_v8 = vld [vmem:[%s355_s1 + $0x28] sm:$0xff]  ;;  %v42_v11 = vsel %vm26_vm3, 0.0, %v34_v7  ;;  %v23_v14 = vld [vmem:[%s355_s1 + $0x30] sm:$0xff]  ;;  %v43_v19 = vsel %vm27_vm5, 0.0, %v35_v13 }
   0x4   :  { %v21_v3 = vld [vmem:[%s355_s1 + $0x20] sm:$0xff]  ;;  %v41_v6 = vsel %vm25_vm1, 0.0, %v33_v2  ;;  %v38_v9 = vld [vmem:[%s354_s0 + $0x28] sm:$0xff]  ;;  %vm30_vm4 = vcmp.gt.f32.partialorder %v22_v8, 0.0  ;;  %vm31_vm6 = vcmp.gt.f32.partialorder %v23_v14, 0.0  ;;  %v39_v16 = vld [vmem:[%s354_s0 + $0x30] sm:$0xff] }
   0x5   :  { %v37_v4 = vld [vmem:[%s354_s0 + $0x20] sm:$0xff]  ;;  %vm29_vm2 = vcmp.gt.f32.partialorder %v21_v3, 0.0  ;;  %220 = vmatprep.mubr.msk.f32.mxu0 %vm57_vm0, %v41_v6  ;;  %v46_v15 = vsel %vm30_vm4, 0.0, %v38_v9  ;;  %v20_v17 = vld [vmem:[%s355_s1 + $0x18] sm:$0xff]  ;;  %v47_v20 = vsel %vm31_vm6, 0.0, %v39_v16 }
   0x6   :  { %v45_v10 = vsel %vm29_vm2, 0.0, %v37_v4  ;;  %221 = vmatmul.mubr.msk.f32.vlgmr.msra.gmra.mrb[0].mxu0 %vm57_vm0, %v42_v11  ;;  %v36_v18 = vld [vmem:[%s354_s0 + $0x18] sm:$0xff]  ;;  %vm28_vm7 = vcmp.gt.f32.partialorder %v20_v17, 0.0  ;;  %v200_v25 = vld [vmem:[%s356_s3] ss:$0 sm:$0xff] }
   0x7   :  { %226 = vmatprep.mubr.msk.f32.mxu1 %vm57_vm0, %v45_v10  ;;  %v24_v21 = vld [vmem:[%s355_s1 + $0x38] sm:$0xff]  ;;  %223 = vmatprep.mubr.msk.f32.mxu0 %vm57_vm0, %v43_v19  ;;  %v44_v23 = vsel %vm28_vm7, 0.0, %v36_v18 }
   0x8   :  { %227 = vmatmul.mubr.msk.f32.vlgmr.msra.gmra.mrb[0].mxu1 %vm57_vm0, %v46_v15  ;;  %v40_v22 = vld [vmem:[%s354_s0 + $0x38] sm:$0xff]  ;;  %vm32_vm8 = vcmp.gt.f32.partialorder %v24_v21, 0.0 }
   0x9   :  { %229 = vmatprep.mubr.msk.f32.mxu1 %vm57_vm0, %v47_v20  ;;  %v48_v24 = vsel %vm32_vm8, 0.0, %v40_v22 }
   0xa   :  { %224 = vmatmul.mubr.msk.f32.gmra.mrb[2].mxu0 %vm57_vm0, %v44_v23 }
   0xc   :  { %230 = vmatmul.mubr.msk.f32.gmra.mrb[2].mxu1 %vm57_vm0, %v48_v24 }
  0xd9   :  { %v222_v26 = vpop.f32.mrb[0].mxu0 }
  0xda   :  { %v154_v27 = vadd.f32 %v222_v26, %v200_v25  ;;  %v148_v29 = vpop.f32.mrb[1].mxu0 }
  0xdb   :  { %v228_v28 = vpop.f32.mrb[0].mxu1  ;;  %v149_v31 = vadd.f32 %v200_v25, %v148_v29 }
  0xdc   :  { %v174_v30 = vadd.f32 %v228_v28, %v200_v25  ;;  %v168_v32 = vpop.f32.mrb[1].mxu1  ;;  %189 = vst.msk [vmem:[%s357_s4 + $0x8] sm:$0xff] %vm187_vm9, %v154_v27 }
  0xdd   :  { %v169_v33 = vadd.f32 %v200_v25, %v168_v32  ;;  %188 = vst.msk [vmem:[%s357_s4] sm:$0xff] %vm187_vm9, %v149_v31  ;;  %v225_v34 = vpop.f32.mrb[2].mxu0 }
  0xde   :  { %193 = vst.msk [vmem:[%s357_s4 + $0x28] sm:$0xff] %vm187_vm9, %v174_v30  ;;  %v164_v35 = vadd.f32 %v225_v34, %v200_v25  ;;  %v158_v37 = vpop.f32.mrb[3].mxu0 }
  0xdf   :  { %192 = vst.msk [vmem:[%s357_s4 + $0x20] sm:$0xff] %vm187_vm9, %v169_v33  ;;  %v231_v36 = vpop.f32.mrb[2].mxu1  ;;  %v159_v39 = vadd.f32 %v200_v25, %v158_v37 }
  0xe0   :  { %v184_v38 = vadd.f32 %v231_v36, %v200_v25  ;;  %v178_v40 = vpop.f32.mrb[3].mxu1  ;;  %191 = vst.msk [vmem:[%s357_s4 + $0x18] sm:$0xff] %vm187_vm9, %v164_v35 }
  0xe1   :  { %v179_v41 = vadd.f32 %v200_v25, %v178_v40  ;;  %190 = vst.msk [vmem:[%s357_s4 + $0x10] sm:$0xff] %vm187_vm9, %v159_v39 }
  0xe2   :  { %195 = vst.msk [vmem:[%s357_s4 + $0x38] sm:$0xff] %vm187_vm9, %v184_v38 }
  0xe3   :  { %194 = vst.msk [vmem:[%s357_s4 + $0x30] sm:$0xff] %vm187_vm9, %v179_v41 }

</bundles_post_ra>
